<compile_context>
chip_gen: v6e
topology: v6e:2x2x1
jax: 0.10.0
libtpu: 0.0.40
codegen_flags: <defaults>
</compile_context>

<pallas_src>
import functools

import jax
import jax.numpy as jnp
from jax import lax
from jax.experimental import pallas as pl
from jax.experimental.pallas import tpu as pltpu


SUB = 8                    # f32 sublanes per vreg -> physical rows per aligned store
MAX_ROW_TILE = 512         # logical rows per grid step (review: raise 256 -> 512; sweepable)
ONE_HOT_MAX_ROWS = 4096    # fused-table row count below which the MXU one-hot path is used
SMEM_SEL_LIMIT = 1 << 20   # bytes of SMEM we allow the scalar-prefetched index vector to use


# --------------------------------------------------------------------------- #
# Kernels
# --------------------------------------------------------------------------- #

def _sk_onehot_kernel(sel_ref, table_ref, out_ref):
    """Small-table fast path: the row gather expressed as a one-hot matmul.

    sel_ref   : (row_tile, 1) int32 VMEM block of fused-table row indices.
    table_ref : (r_pad, D) fused table, resident in VMEM (constant index_map).
    out_ref   : (row_tile, D) output tile.

    Moves the gather onto the MXU (idle otherwise); the one-hot build is a
    broadcasted compare + cast on the VPU.  Only profitable for small r_pad.
    """
    rows = sel_ref.shape[0]
    r_pad = table_ref.shape[0]
    row_ids = lax.broadcasted_iota(jnp.int32, (rows, r_pad), 1)
    onehot = (sel_ref[...] == row_ids).astype(table_ref.dtype)
    out_ref[...] = jnp.dot(onehot, table_ref[...],
                           preferred_element_type=jnp.float32).astype(out_ref.dtype)


def _sk_gather_kernel(pack, emb_dim, chunks,     # static (bound via functools.partial)
                      sel_ref,                   # scalar prefetch: [n_pad] int32 (SMEM)
                      table_ref,                 # [r_pad, pack*emb_dim] resident VMEM
                      out_ref):                  # (chunks*SUB, pack*emb_dim) output tile
    """General path: per-row dynamic gather with a lane-dense packed output."""
    t = pl.program_id(0)
    phys_d = pack * emb_dim
    log_per_chunk = SUB * pack                   # logical rows per (SUB, phys_d) store
    row_tile = chunks * log_per_chunk

    # Hoisted lane plane + per-window masks (JAX does not CSE broadcast/iota,
    # so re-emitting them per row would burn VALU slots for nothing).
    lane_masks = ()
    if pack > 1:
        lane = lax.broadcasted_iota(jnp.int32, (1, phys_d), 1)
        lane_masks = tuple(lane >= p * emb_dim for p in range(1, pack))

    def chunk_body(c, carry):
        base = t * row_tile + c * log_per_chunk
        phys_rows = []
        for j in range(SUB):
            # One dynamic gather per logical row from the fused table.
            parts = [table_ref[pl.ds(sel_ref[base + j * pack + p], 1), :]
                     for p in range(pack)]
            row = parts[0]
            for p in range(1, pack):
                # Table is lane-replicated (done once at setup), so selecting
                # lanes >= p*D from parts[p] drops logical row p into its lane
                # window with pure VPU selects (no XLU shifts).
                row = jnp.where(lane_masks[p - 1], parts[p], row)
            phys_rows.append(row)
        tile = jnp.concatenate(phys_rows, axis=0)                  # (SUB, phys_d)
        # Single aligned, unmasked full-lane store per chunk.
        out_ref[pl.ds(pl.multiple_of(c * SUB, SUB), SUB), :] = tile
        return carry

    # Static trip count, fully unrolled (review): gives the LLO scheduler
    # visibility to interleave scalar index loads, dynamic vlds, selects and the
    # store across chunks.  Padded tail rows gather row 0 (sel padded with 0)
    # and are sliced off by the wrapper, so always running all chunks is safe.
    lax.fori_loop(0, chunks, chunk_body, 0, unroll=True)


# --------------------------------------------------------------------------- #
# Wrapper helpers
# --------------------------------------------------------------------------- #

def _compiler_params():
    # Per-generation scoped VMEM limit (review: a hard-coded 64 MiB equals all
    # of v7x's physical per-TC VMEM and leaves no headroom).  ~3/4 of capacity
    # gives ~48 MiB on v7x and ~96 MiB on v5e/v6e; fall back to the compiler
    # default if the query is unavailable.
    vmem_limit = None
    try:
        vmem_limit = int(pltpu.get_tpu_info().vmem_capacity_bytes) * 3 // 4
    except Exception:
        vmem_limit = None
    kwargs = dict(
        # Output tiles are independent -> allow megacore sharding.
        # TODO(synk): on v7x verify the "parallel" axis really splits across the
        # two TensorCores; otherwise switch to CORE_PARALLEL / pl.core_map.
        dimension_semantics=("parallel",),
    )
    if vmem_limit:
        kwargs["vmem_limit_bytes"] = vmem_limit
    return pltpu.CompilerParams(**kwargs)


def _pick_row_tile(n, granule):
    """Largest tile (<= MAX_ROW_TILE, multiple of `granule`) that covers small N
    without excessive padding.  MAX_ROW_TILE is a multiple of every legal granule."""
    rounded = ((n + granule - 1) // granule) * granule
    return min(MAX_ROW_TILE, rounded)


def prepare_sk_embedding(weight_h, weight_hash, *, one_hot_max_rows=ONE_HOT_MAX_ROWS):
    """One-time table preparation (hoisted out of the per-call forward, per review).

    Builds the fused [weight_h ; weight_hash] table (and, for the packed-gather
    path, its lane replication) ONCE at parameter-setup time, so each forward
    issues no HBM copy traffic beyond the kernel's own DMA.
    """
    hot_nums, emb_dim = weight_h.shape
    hash_size, emb_dim2 = weight_hash.shape
    assert emb_dim == emb_dim2, "weight_h / weight_hash embedding dims must match"
    assert weight_h.dtype == weight_hash.dtype == jnp.float32, (
        "kernel layout (SUB=8 sublanes, 32-bit rows) assumes float32 tables")
    # TODO(synk): bf16 resident tables (SUB=16) would halve VMEM residency.

    rows = hot_nums + hash_size
    table = jnp.concatenate([weight_h, weight_hash], axis=0)          # [rows, D]
    # Pad rows to a multiple of 128: MXU-friendly contraction dim for the
    # one-hot path, sublane-aligned for the gather path.  Padded rows are never
    # selected because every sel index is < rows.
    r_pad = ((rows + 127) // 128) * 128
    if r_pad != rows:
        table = jnp.pad(table, ((0, r_pad - rows), (0, 0)))

    if r_pad <= one_hot_max_rows:
        mode, pack = "onehot", 1
    elif emb_dim < 128 and 128 % emb_dim == 0:
        mode, pack = "gather_packed", 128 // emb_dim
        # Lane-replicate once (setup-time, not per-call) so each gathered row
        # already covers every lane window and the per-row select is pure VPU.
        # TODO(synk): for very large tables, in-kernel pltpu.roll lane placement
        # would halve the HBM footprint of this buffer.
        table = jnp.tile(table, (1, pack))
    else:
        mode, pack = "gather", 1

    return dict(table=table, mode=mode, pack=pack, hot_nums=hot_nums,
                hash_size=hash_size, emb_dim=emb_dim, rows=rows)


def _forward_onehot(sel_idx, table, n, emb_dim):
    r_pad = table.shape[0]
    row_tile = _pick_row_tile(n, SUB)
    n_pad = pl.cdiv(n, row_tile) * row_tile
    if n_pad != n:
        sel_idx = jnp.pad(sel_idx, (0, n_pad - n))
    sel_col = sel_idx.reshape(n_pad, 1)           # blocked VMEM column, no SMEM ceiling

    out = pl.pallas_call(
        _sk_onehot_kernel,
        out_shape=jax.ShapeDtypeStruct((n_pad, emb_dim), table.dtype),
        grid=(n_pad // row_tile,),
        in_specs=[
            pl.BlockSpec((row_tile, 1), lambda i: (i, 0)),
            # Full fused table resident in VMEM; constant index_map -> fetched once.
            pl.BlockSpec((r_pad, emb_dim), lambda i: (0, 0)),
        ],
        out_specs=pl.BlockSpec((row_tile, emb_dim), lambda i: (i, 0)),
        compiler_params=_compiler_params(),
    )(sel_col, table)
    return out[:n]


def _forward_gather(sel_idx, table, n, emb_dim, pack):
    r_pad, phys_d = table.shape                    # phys_d == pack * emb_dim
    granule = SUB * pack
    row_tile = _pick_row_tile(n, granule)
    n_pad = pl.cdiv(n, row_tile) * row_tile
    if n_pad != n:
        sel_idx = jnp.pad(sel_idx, (0, n_pad - n))

    if 4 * n_pad > SMEM_SEL_LIMIT:
        # TODO(synk): for very large lookup counts, block sel_idx per tile
        # (SMEM BlockSpec) or chunk N at the wrapper level instead of
        # scalar-prefetching the whole vector (1-D SMEM pads to next_pow2(4N)).
        raise NotImplementedError(
            "lookup count too large for a scalar-prefetched index vector")

    chunks = row_tile // granule
    kernel = functools.partial(_sk_gather_kernel, pack, emb_dim, chunks)

    out_phys = pl.pallas_call(
        kernel,
        out_shape=jax.ShapeDtypeStruct((n_pad // pack, phys_d), table.dtype),
        grid_spec=pltpu.PrefetchScalarGridSpec(
            num_scalar_prefetch=1,
            grid=(n_pad // row_tile,),
            in_specs=[
                # Full table resident in VMEM (block == full array, constant
                # index_map -> never re-fetched across grid steps; block
                # invariance should keep it single-buffered).
                # TODO(synk): tables beyond VMEM residency (especially v7x's
                # 64 MiB) need a memory_space=pl.ANY ref plus a manual
                # double-buffered make_async_copy row gather from HBM.
                pl.BlockSpec((r_pad, phys_d), lambda t, sel: (0, 0)),
            ],
            out_specs=pl.BlockSpec((row_tile // pack, phys_d),
                                   lambda t, sel: (t, 0)),
        ),
        compiler_params=_compiler_params(),
    )(sel_idx, table)

    # [n_pad//pack, pack*D] row-major is bit-identical to [n_pad, D] row-major.
    return out_phys.reshape(n_pad, emb_dim)[:n]


def sk_embedding_bag_forward(dic, dic_mask, offsets, prepared):
    """SKEmbeddingBag.forward (post sketch query) on TPU.

    Assumes single-element bags (offsets == arange(N)), the only layout for
    which the reference torch.where broadcast is well formed; mean pooling of a
    one-element bag is the identity, so the forward is a masked per-row gather.
    """
    n = dic.shape[0]
    if offsets is not None:
        assert offsets.shape[0] == n, (
            "SKEmbeddingBag kernel assumes one-element bags (offsets == arange(N))")
    hot_nums = prepared["hot_nums"]
    hash_size = prepared["hash_size"]
    emb_dim = prepared["emb_dim"]

    # query() returns abs(dic); take abs again so the floor-mod below matches
    # the torch reference even if that upstream guarantee is ever relaxed.
    dic = jnp.abs(dic).astype(jnp.int32)
    # hot/hash select done at the index level against the fused table.
    sel_idx = jnp.where(dic_mask, dic % hot_nums,
                        hot_nums + (dic % hash_size)).astype(jnp.int32)

    if prepared["mode"] == "onehot":
        return _forward_onehot(sel_idx, prepared["table"], n, emb_dim)
    return _forward_gather(sel_idx, prepared["table"], n, emb_dim, prepared["pack"])


# --------------------------------------------------------------------------- #
# Demo / self-test
# --------------------------------------------------------------------------- #

if __name__ == "__main__":
    key = jax.random.PRNGKey(0)

    # config implied by __init__
    num_categories = 1000
    compress_rate = 0.5
    hot_rate = 0.2
    embedding_dim = 64
    hot_nums = int(num_categories * compress_rate * hot_rate)          # 100
    hash_size = int(num_categories * compress_rate * (1 - hot_rate))   # 400
    n_lookups = 12  # number of lookups (== number of bags)

    k1, k2, k3 = jax.random.split(key, 3)
    bound = (1.0 / num_categories) ** 0.5
    weight_h = jax.random.uniform(
        k1, (hot_nums, embedding_dim), jnp.float32, -bound, bound)
    weight_hash = jax.random.uniform(
        k2, (hash_size, embedding_dim), jnp.float32, -bound, bound)

    raw_input = jax.random.randint(k3, (n_lookups,), 0, num_categories, jnp.int32)
    # TODO(synk): the ctypes C sketch (batch_query) producing (dic_mask, dic)
    # has no Pallas equivalent; emulate it deterministically here.
    dic = raw_input                      # sketch slot id surrogate (non-negative)
    dic_mask = (raw_input % 5) == 0      # "hot" membership surrogate
    offsets = jnp.arange(n_lookups, dtype=jnp.int32)

    # pure-JAX reference of the forward semantics
    ref = jnp.where(dic_mask[:, None],
                    weight_h[dic % hot_nums],
                    weight_hash[dic % hash_size])

    # One-time table preparation (hoisted out of the per-call wrapper).
    prep_onehot = prepare_sk_embedding(weight_h, weight_hash)      # small-table MXU path
    prep_gather = prepare_sk_embedding(weight_h, weight_hash,
                                       one_hot_max_rows=0)         # packed-gather path

    out_onehot = jax.block_until_ready(
        sk_embedding_bag_forward(dic, dic_mask, offsets, prep_onehot))
    out_gather = jax.block_until_ready(
        sk_embedding_bag_forward(dic, dic_mask, offsets, prep_gather))

    for out in (out_onehot, out_gather):
        assert out.shape == (n_lookups, embedding_dim) and out.dtype == jnp.float32
        assert jnp.allclose(out, ref), "mismatch vs reference"
    print("KERNEL_OK")
</pallas_src>

<mosaic_0001>
module attributes {stable_mosaic.version = 11 : i64} {
  func.func @_sk_onehot_kernel(%arg0: i32, %arg1: memref<16x1xi32, #tpu.memory_space<vmem>>, %arg2: memref<512x64xf32, #tpu.memory_space<vmem>>, %arg3: memref<16x64xf32, #tpu.memory_space<vmem>>) attributes {dimension_semantics = [#tpu.dimension_semantics<parallel>], iteration_bounds = array<i64: 1>, scalar_prefetch = 0 : i64, scratch_operands = 0 : i64, tpu.core_type = #tpu.core_type<tc>, window_params = [{transform_indices = @transform_0, window_bounds = array<i64: 16, 1>}, {pipeline_mode = #tpu.pipeline_mode<synchronous>, transform_indices = @transform_1, window_bounds = array<i64: 512, 64>}, {transform_indices = @transform_2, window_bounds = array<i64: 16, 64>}]} {
    %0 = tpu.iota {dimensions = array<i32: 1>} : vector<16x512xi32>
    %c0 = arith.constant 0 : index
    %c0_0 = arith.constant 0 : index
    %1 = vector.load %arg1[%c0, %c0_0] : memref<16x1xi32, #tpu.memory_space<vmem>>, vector<16x1xi32>
    %2 = vector.broadcast %1 : vector<16x1xi32> to vector<16x512xi32>
    %3 = arith.cmpi eq, %2, %0 : vector<16x512xi32>
    %4 = arith.extui %3 : vector<16x512xi1> to vector<16x512xi32>
    %5 = arith.sitofp %4 : vector<16x512xi32> to vector<16x512xf32>
    %c0_1 = arith.constant 0 : index
    %c0_2 = arith.constant 0 : index
    %6 = vector.load %arg2[%c0_1, %c0_2] : memref<512x64xf32, #tpu.memory_space<vmem>>, vector<512x64xf32>
    %cst = arith.constant dense<0.000000e+00> : vector<16x64xf32>
    %7 = tpu.matmul %5, %6, %cst {dimension_numbers = #tpu.dot_dimension_numbers<[1], [0], [0], [1], [0, 0, 1, 1], [], []>} : vector<16x512xf32>, vector<512x64xf32>, vector<16x64xf32> -> vector<16x64xf32>
    %c0_3 = arith.constant 0 : index
    %c0_4 = arith.constant 0 : index
    %8 = vector.load %arg3[%c0_3, %c0_4] : memref<16x64xf32, #tpu.memory_space<vmem>>, vector<16x64xf32>
    tpu.vector_store %arg3[%c0_3, %c0_4], %7 {strides = array<i32>} : memref<16x64xf32, #tpu.memory_space<vmem>>, vector<16x64xf32>,
    return
  }
  func.func @transform_0(%arg0: i32) -> (i32, i32) {
    %c0_i32 = arith.constant 0 : i32
    %c0_i32_0 = arith.constant 0 : i32
    return %arg0, %c0_i32 : i32, i32
  }
  func.func @transform_1(%arg0: i32) -> (i32, i32) {
    %c0_i32 = arith.constant 0 : i32
    %c0_i32_0 = arith.constant 0 : i32
    %c0_i32_1 = arith.constant 0 : i32
    return %c0_i32, %c0_i32_0 : i32, i32
  }
  func.func @transform_2(%arg0: i32) -> (i32, i32) {
    %c0_i32 = arith.constant 0 : i32
    %c0_i32_0 = arith.constant 0 : i32
    return %arg0, %c0_i32 : i32, i32
  }
}

</mosaic_0001>

<bundles_post_ra>
// kernel: tpu_custom_call.1
= control target key start
LH: loop header
LB: loop body
LE: loop exit
PB: predicated region body
PF: predicated region fallthrough
CT: control target
= control target key end

     0   :  { %v402_v2 = vmov 0   ;;  %s623_s0 = inlined_call_operand.vmem [shape: s32[16,1], index: 0, kind: input, shape index: {}]   ;;  %s624_s1 = inlined_call_operand.vmem [shape: f32[512,64], index: 1, kind: input, shape index: {}]   ;;  %s625_s2 = inlined_call_operand.hbm [shape: f32[16,64], index: 2, kind: output, shape index: {}]  }
   0x1   :  { %v17_v0 = vld [vmem:[%s623_s0] sm:$0xff]  ;;  %v80_v1 = vld [vmem:[%s624_s1 + $0xf8] sm:$0xff]  ;;  %379 = vset.pattern.permute.xlu0 %v402_v2  ;;  %v79_v6 = vld [vmem:[%s624_s1 + $0xf0] sm:$0xff] }
   0x2   :  { %298 = vmatprep.subr.mxu0 %v80_v1  ;;  %v112_v3 = vld [vmem:[%s624_s1 + $0x1f8] sm:$0xff]  ;;  %20 = vperm.xlu0 %379, %v17_v0   ;;  %v111_v7 = vld [vmem:[%s624_s1 + $0x1f0] sm:$0xff]  ;;  %v18_v9 = vld [vmem:[%s623_s0 + $0x8] sm:$0xff] }
   0x3   :  { %v64_v4 = vld [vmem:[%s624_s1 + $0x78] sm:$0xff]  ;;  %336 = vmatprep.subr.mxu1 %v112_v3  ;;  %v63_v8 = vld [vmem:[%s624_s1 + $0x70] sm:$0xff]  ;;  %v78_v11 = vld [vmem:[%s624_s1 + $0xe8] sm:$0xff] }
   0x4   :  { %v96_v5 = vld [vmem:[%s624_s1 + $0x178] sm:$0xff]  ;;  %299 = vmatpush3.msra.mxu0 %v64_v4  ;;  %v95_v10 = vld [vmem:[%s624_s1 + $0x170] sm:$0xff]  ;;  %v110_v12 = vld [vmem:[%s624_s1 + $0x1e8] sm:$0xff] }
   0x5   :  { %337 = vmatpush3.msra.mxu1 %v96_v5  ;;  %300 = vmatprep.subr.mxu0 %v79_v6  ;;  %v62_v13 = vld [vmem:[%s624_s1 + $0x68] sm:$0xff]  ;;  %v77_v15 = vld [vmem:[%s624_s1 + $0xe0] sm:$0xff]  ;;  %v76_v19 = vld [vmem:[%s624_s1 + $0xd8] sm:$0xff] }
   0x6   :  { %338 = vmatprep.subr.mxu1 %v111_v7  ;;  %301 = vmatpush3.msra.mxu0 %v63_v8  ;;  %v94_v14 = vld [vmem:[%s624_s1 + $0x168] sm:$0xff]  ;;  %v109_v16 = vld [vmem:[%s624_s1 + $0x1e0] sm:$0xff]  ;;  %v108_v20 = vld [vmem:[%s624_s1 + $0x1d8] sm:$0xff] }
   0x7   :  { %339 = vmatpush3.msra.mxu1 %v95_v10  ;;  %23 = vperm.xlu0 %379, %v18_v9   ;;  %v61_v17 = vld [vmem:[%s624_s1 + $0x60] sm:$0xff]  ;;  %v60_v21 = vld [vmem:[%s624_s1 + $0x58] sm:$0xff]  ;;  %v75_v23 = vld [vmem:[%s624_s1 + $0xd0] sm:$0xff] }
   0x8   :  { %302 = vmatprep.subr.mxu0 %v78_v11  ;;  %340 = vmatprep.subr.mxu1 %v110_v12  ;;  %v93_v18 = vld [vmem:[%s624_s1 + $0x160] sm:$0xff]  ;;  %v92_v22 = vld [vmem:[%s624_s1 + $0x158] sm:$0xff]  ;;  %v107_v24 = vld [vmem:[%s624_s1 + $0x1d0] sm:$0xff] }
   0x9   :  { %303 = vmatpush3.msra.mxu0 %v62_v13  ;;  %341 = vmatpush3.msra.mxu1 %v94_v14  ;;  %v59_v25 = vld [vmem:[%s624_s1 + $0x50] sm:$0xff]  ;;  %v74_v27 = vld [vmem:[%s624_s1 + $0xc8] sm:$0xff]  ;;  %v73_v31 = vld [vmem:[%s624_s1 + $0xc0] sm:$0xff] }
   0xa   :  { %304 = vmatprep.subr.mxu0 %v77_v15  ;;  %342 = vmatprep.subr.mxu1 %v109_v16  ;;  %v91_v26 = vld [vmem:[%s624_s1 + $0x150] sm:$0xff]  ;;  %v106_v28 = vld [vmem:[%s624_s1 + $0x1c8] sm:$0xff]  ;;  %v105_v32 = vld [vmem:[%s624_s1 + $0x1c0] sm:$0xff] }
   0xb   :  { %305 = vmatpush3.msra.mxu0 %v61_v17  ;;  %343 = vmatpush3.msra.mxu1 %v93_v18  ;;  %v58_v29 = vld [vmem:[%s624_s1 + $0x48] sm:$0xff]  ;;  %v57_v33 = vld [vmem:[%s624_s1 + $0x40] sm:$0xff]  ;;  %v72_v35 = vld [vmem:[%s624_s1 + $0xb8] sm:$0xff] }
   0xc   :  { %306 = vmatprep.subr.mxu0 %v76_v19  ;;  %344 = vmatprep.subr.mxu1 %v108_v20  ;;  %v90_v30 = vld [vmem:[%s624_s1 + $0x148] sm:$0xff]  ;;  %v89_v34 = vld [vmem:[%s624_s1 + $0x140] sm:$0xff]  ;;  %v104_v36 = vld [vmem:[%s624_s1 + $0x1b8] sm:$0xff] }
   0xd   :  { %307 = vmatpush3.msra.mxu0 %v60_v21  ;;  %345 = vmatpush3.msra.mxu1 %v92_v22  ;;  %v56_v37 = vld [vmem:[%s624_s1 + $0x38] sm:$0xff]  ;;  %v71_v39 = vld [vmem:[%s624_s1 + $0xb0] sm:$0xff]  ;;  %v70_v43 = vld [vmem:[%s624_s1 + $0xa8] sm:$0xff] }
   0xe   :  { %308 = vmatprep.subr.mxu0 %v75_v23  ;;  %346 = vmatprep.subr.mxu1 %v107_v24  ;;  %v88_v38 = vld [vmem:[%s624_s1 + $0x138] sm:$0xff]  ;;  %v103_v40 = vld [vmem:[%s624_s1 + $0x1b0] sm:$0xff]  ;;  %v102_v44 = vld [vmem:[%s624_s1 + $0x1a8] sm:$0xff] }
   0xf   :  { %309 = vmatpush3.msra.mxu0 %v59_v25  ;;  %347 = vmatpush3.msra.mxu1 %v91_v26  ;;  %v55_v41 = vld [vmem:[%s624_s1 + $0x30] sm:$0xff]  ;;  %v54_v45 = vld [vmem:[%s624_s1 + $0x28] sm:$0xff]  ;;  %v69_v47 = vld [vmem:[%s624_s1 + $0xa0] sm:$0xff] }
  0x10   :  { %310 = vmatprep.subr.mxu0 %v74_v27  ;;  %348 = vmatprep.subr.mxu1 %v106_v28  ;;  %v87_v42 = vld [vmem:[%s624_s1 + $0x130] sm:$0xff]  ;;  %v86_v46 = vld [vmem:[%s624_s1 + $0x128] sm:$0xff]  ;;  %v101_v48 = vld [vmem:[%s624_s1 + $0x1a0] sm:$0xff] }
  0x11   :  { %311 = vmatpush3.msra.mxu0 %v58_v29  ;;  %349 = vmatpush3.msra.mxu1 %v90_v30  ;;  %v53_v49 = vld [vmem:[%s624_s1 + $0x20] sm:$0xff] }
  0x12   :  { %312 = vmatprep.subr.mxu0 %v73_v31  ;;  %350 = vmatprep.subr.mxu1 %v105_v32 }
  0x13   :  { %313 = vmatpush3.msra.mxu0 %v57_v33  ;;  %351 = vmatpush3.msra.mxu1 %v89_v34 }
  0x14   :  { %314 = vmatprep.subr.mxu0 %v72_v35  ;;  %352 = vmatprep.subr.mxu1 %v104_v36 }
  0x15   :  { %315 = vmatpush3.msra.mxu0 %v56_v37  ;;  %353 = vmatpush3.msra.mxu1 %v88_v38 }
  0x16   :  { %316 = vmatprep.subr.mxu0 %v71_v39  ;;  %354 = vmatprep.subr.mxu1 %v103_v40 }
  0x17   :  { %317 = vmatpush3.msra.mxu0 %v55_v41  ;;  %355 = vmatpush3.msra.mxu1 %v87_v42 }
  0x18   :  { %318 = vmatprep.subr.mxu0 %v70_v43 }
  0x19   :  { %7 = vsyncpa [#allocation3], 0  ;;  %356 = vmatprep.subr.mxu1 %v102_v44  ;;  %319 = vmatpush3.msra.mxu0 %v54_v45  ;;  %v85_v50 = vld [vmem:[%s624_s1 + $0x120] sm:$0xff]  ;;  %v68_v51 = vld [vmem:[%s624_s1 + $0x98] sm:$0xff]  ;;  %v12_v3 = vlaneseq  ;;  %v403_v9 = vmov 1.0   ;;  %vm263_vm8 = vcmask 523264  }
  0x1a   :  { %357 = vmatpush3.msra.mxu1 %v86_v46  ;;  %320 = vmatprep.subr.mxu0 %v69_v47  ;;  %v100_v52 = vld [vmem:[%s624_s1 + $0x198] sm:$0xff]  ;;  %v67_v55 = vld [vmem:[%s624_s1 + $0x90] sm:$0xff]  ;;  %v66_v59 = vld [vmem:[%s624_s1 + $0x88] sm:$0xff] }
  0x1b   :  { %v52_v53 = vld [vmem:[%s624_s1 + $0x18] sm:$0xff]  ;;  %358 = vmatprep.subr.mxu1 %v101_v48  ;;  %321 = vmatpush3.msra.mxu0 %v53_v49  ;;  %v99_v56 = vld [vmem:[%s624_s1 + $0x190] sm:$0xff]  ;;  %v98_v60 = vld [vmem:[%s624_s1 + $0x188] sm:$0xff]  ;;  %v13_v4 = vand.u32 127, %v12_v3 }
  0x1c   :  { %v84_v54 = vld [vmem:[%s624_s1 + $0x118] sm:$0xff]  ;;  %359 = vmatpush3.msra.mxu1 %v85_v50  ;;  %322 = vmatprep.subr.mxu0 %v68_v51  ;;  %v51_v57 = vld [vmem:[%s624_s1 + $0x10] sm:$0xff]  ;;  %v50_v61 = vld [vmem:[%s624_s1 + $0x8] sm:$0xff] }
  0x1d   :  { %360 = vmatprep.subr.mxu1 %v100_v52  ;;  %323 = vmatpush3.msra.mxu0 %v52_v53  ;;  %v83_v58 = vld [vmem:[%s624_s1 + $0x110] sm:$0xff]  ;;  %v82_v62 = vld [vmem:[%s624_s1 + $0x108] sm:$0xff]  ;;  %v65_v63 = vld [vmem:[%s624_s1 + $0x80] sm:$0xff]  ;;  %v14_v5 = vadd.s32 128, %v13_v4  ;;  %v16_v6 = vadd.s32 384, %v13_v4  ;;  %v15_v7 = vadd.s32 256, %v13_v4 }
  0x1e   :  { %361 = vmatpush3.msra.mxu1 %v84_v54  ;;  %324 = vmatprep.subr.mxu0 %v67_v55  ;;  %v97_v0 = vld [vmem:[%s624_s1 + $0x180] sm:$0xff] }
  0x1f   :  { %362 = vmatprep.subr.mxu1 %v99_v56  ;;  %325 = vmatpush3.msra.mxu0 %v51_v57  ;;  %v49_v1 = vld [vmem:[%s624_s1] sm:$0xff] }
  0x20   :  { %363 = vmatpush3.msra.mxu1 %v83_v58  ;;  %326 = vmatprep.subr.mxu0 %v66_v59  ;;  %v81_v2 = vld [vmem:[%s624_s1 + $0x100] sm:$0xff]  ;;  %s404_s1 = smov [#allocation2]  }
  0x21   :  { %364 = vmatprep.subr.mxu1 %v98_v60  ;;  %327 = vmatpush3.msra.mxu0 %v50_v61  ;;  %s271_s25 = sshll.u32 %s404_s1, 4  ;;  %s272_s25 = int_to_ptr.vmem [resolvable:$true] %s271_s25 }
  0x22   :  { %365 = vmatpush3.msra.mxu1 %v82_v62  ;;  %328 = vmatprep.subr.mxu0 %v65_v63  ;;  %s380_s26 = scalar_lea.vmem %s272_s25, 256  ;;  %p385_p1 = scmp.lt.s32.totalorder %s272_s25, %s272_s25 }
  0x23   :  { %366 = vmatprep.subr.mxu1 %v97_v0  ;;  %329 = vmatpush3.msra.mxu0 %v49_v1  ;;  %p381_p0 = scmp.ne.s32.totalorder %s272_s25, %s380_s26  ;;  %p386_p2 = scmp.lt.s32.totalorder %s380_s26, %s380_s26 }
  0x24   :  { %367 = vmatpush3.msra.mxu1 %v81_v2 }
  0x25   :  { %p387_p3 = por %p386_p2, %p385_p1 }
  0x27   :  { %p388_p4 = pnand %p387_p3, %p381_p0 }
  0x7d   :  { %v21_v8 = vpop.permute.xlu0 %20 }
  0x7e   :  { %vm26_vm0 = vcmp.eq.s32.totalorder %v21_v8, %v14_v5  ;;  %vm28_vm1 = vcmp.eq.s32.totalorder %v21_v8, %v16_v6  ;;  %vm25_vm2 = vcmp.eq.s32.totalorder %v21_v8, %v13_v4  ;;  %vm27_vm3 = vcmp.eq.s32.totalorder %v21_v8, %v15_v7 }
  0x7f   :  { %290 = vmatprep.mubr.msk.f32.mxu0 %vm26_vm0, %v403_v9  ;;  %294 = vmatprep.mubr.msk.f32.mxu1 %vm28_vm1, %v403_v9 }
  0x80   :  { %291 = vmatmul.mubr.msk.f32.vlgmr.msra.gmra.mxu0 %vm25_vm2, %v403_v9  ;;  %295 = vmatmul.mubr.msk.f32.vlgmr.msra.gmra.mxu1 %vm27_vm3, %v403_v9 }
  0x82   :  { %v24_v10 = vpop.permute.xlu0 %23 }
  0x83   :  { %vm30_vm4 = vcmp.eq.s32.totalorder %v24_v10, %v14_v5  ;;  %vm32_vm5 = vcmp.eq.s32.totalorder %v24_v10, %v16_v6  ;;  %vm29_vm6 = vcmp.eq.s32.totalorder %v24_v10, %v13_v4  ;;  %vm31_vm7 = vcmp.eq.s32.totalorder %v24_v10, %v15_v7 }
  0x84   :  { %292 = vmatprep.mubr.msk.f32.mxu0 %vm30_vm4, %v403_v9  ;;  %296 = vmatprep.mubr.msk.f32.mxu1 %vm32_vm5, %v403_v9 }
  0x85   :  { %293 = vmatmul.mubr.msk.f32.gmra.mxu0 %vm29_vm6, %v403_v9  ;;  %297 = vmatmul.mubr.msk.f32.gmra.mxu1 %vm31_vm7, %v403_v9 }
 0x140   :  { %v330_v11 = vpop.f32.mrf.mxu0  ;;  %v368_v12 = vpop.f32.mrf.mxu1 }
 0x142   :  { %v331_v13 = vpop.f32.mrf.mxu0  ;;  %v369_v14 = vpop.f32.mrf.mxu1 }
 0x143   :  { %v332_v15 = vadd.f32 %v331_v13, %v330_v11  ;;  %v370_v16 = vadd.f32 %v369_v14, %v368_v12 }
 0x145   :  { %v333_v17 = vpop.f32.mrf.mxu0  ;;  %v371_v18 = vpop.f32.mrf.mxu1  ;;  %v255_v19 = vadd.f32 %v370_v16, %v332_v15 }
 0x147   :  { %v334_v20 = vpop.f32.mrf.mxu0  ;;  %v372_v21 = vpop.f32.mrf.mxu1  ;;  %264 = vst.msk [vmem:[#allocation2] sm:$0xff] %vm263_vm8, %v255_v19 }
 0x148   :  { %v335_v22 = vadd.f32 %v334_v20, %v333_v17  ;;  %v373_v23 = vadd.f32 %v372_v21, %v371_v18 }
 0x14a   :  { %v260_v24 = vadd.f32 %v373_v23, %v335_v22 }
 0x14c   :  { %265 = vst.msk [vmem:[#allocation2 + $0x8] sm:$0xff] %vm263_vm8, %v260_v24 }
 0x14d   :  { %391 = shalt.err (!%p388_p4)
}
 0x14e   :  { %s405_s27 = smov 128   ;;  %s406_s28 = smov 8  }
 0x14f   :  { %277 = dma.vmem_to_hbm [thread:$0]  %s272_s25, 256, %s625_s2, [#allocation3], %s405_s27, %s405_s27, %s406_s28  }
 0x150   :  { %400 = dma.done.wait [#allocation3], 256  }
 0x151   :  { %401 = vsyncadd [#allocation3], 4294967040 }
 0x152   :  { %281 = vsyncpa [#allocation3], 1 }

</bundles_post_ra>
